<compile_context>
chip_gen: v7x
topology: tpu7x:2x2x1
jax: 0.10.0
libtpu: 0.0.40
codegen_flags: <defaults>
</compile_context>

<pallas_src>
import functools

import jax
import jax.numpy as jnp
import numpy as np
from jax.experimental import pallas as pl
from jax.experimental.pallas import tpu as pltpu


def _sigmoid(x):
    # tanh form: one EUP transcendental + a VPU fma (vs exp + exact divide).
    return 0.5 * (jnp.tanh(0.5 * x) + 1.0)


# ----------------------------- fused kernel ---------------------------------
def _fused_kernel(patch_ref, w_ref, b_ref, x3_ref, o_ref, *, C, C3, H, W, NIMG):
    # patch_ref: (9*Cin, NIMG*H*W)  bf16 im2col patches, images along lanes
    # w_ref    : (C, 9*Cin)         bf16 conv weight (kh,kw,cin K-order)
    # b_ref    : (C, 1)             f32 conv bias
    # x3_ref   : (2, C3, H*W)       f32 passthrough
    # o_ref    : (2, 2*C+C3, H*W)   f32 output
    HW = H * W

    # One MXU push for all three images: (C, 27) x (27, NIMG*HW) -> f32.
    y = jnp.dot(w_ref[...], patch_ref[...], preferred_element_type=jnp.float32)
    y = y + b_ref[...]                                # bias: one VPU fma

    # ---- image 0: conv -> sigmoid -> softmax(dim=1 == H) -> two slabs ------
    v1 = _sigmoid(y[:, 0:HW])                         # lane offset 0, aligned
    # v1 in (0,1): max-shift is not needed for exp stability (keep this
    # assumption explicit -- it only holds because of the preceding sigmoid).
    e = jnp.exp(v1)
    # softmax denominator: sum over h for fixed (c, w).  Lanes flatten as
    # p = h*W + w, so the reduction is over stride-W lane groups; a cyclic
    # roll-accumulate keeps it entirely on the XLU (free slot vs VPU/EUP).
    denom = e
    if (H & (H - 1)) == 0:                            # power-of-two H: log steps
        shift = W
        while shift < HW:
            denom = denom + pltpu.roll(denom, shift=shift, axis=1)
            shift *= 2
    else:
        # TODO(synk): O(H) XLU fallback; switch to a doubling scheme (or an
        # MXU 0/1 summation matmul) if a non-power-of-two H ever runs hot.
        for h in range(1, H):
            denom = denom + pltpu.roll(e, shift=h * W, axis=1)
    v2 = e * pl.reciprocal(denom, approx=True)        # softmax(v1, dim=1)

    o_ref[0, 0:C] = _sigmoid(v2 + 1.0)                # sigmoid(v3)
    o_ref[1, 0:C] = _sigmoid(_sigmoid(v2))            # sigmoid(v4)

    # ---- images 1..NIMG-1 (x2 batch): one wide sigmoid(sigmoid(.)) slab ----
    t = _sigmoid(_sigmoid(y[:, HW:NIMG * HW]))        # (C, (NIMG-1)*HW)
    for i in range(NIMG - 1):                         # vreg-aligned lane slices
        o_ref[i, C:2 * C] = t[:, i * HW:(i + 1) * HW]

    # ---- passthrough x3 (cat along channels) --------------------------------
    o_ref[:, 2 * C:2 * C + C3] = x3_ref[...]


# ------------------------------- wrapper -------------------------------------
def model_forward(x1, x2, x3, w_oihw, bias):
    """x1: (Cin, H, W) unbatched; x2: (B2, Cin, H, W); x3: (B2, C3, H, W)."""
    Cin, H, W = x1.shape
    Cout = w_oihw.shape[0]
    B2 = x2.shape[0]
    C3 = x3.shape[1]
    HW = H * W
    N = 1 + B2

    # im2col for all conv images in one small fused XLA op, laid out K-major
    # with images contiguous along lanes: (9*Cin, N*HW).
    x_all = jnp.concatenate([x1[None], x2], axis=0)                    # (N,Cin,H,W)
    xp = jnp.pad(x_all, ((0, 0), (0, 0), (1, 1), (1, 1)))
    taps = [xp[:, :, kh:kh + H, kw:kw + W] for kh in range(3) for kw in range(3)]
    patches = jnp.stack(taps, axis=1).reshape(N, 9 * Cin, HW)          # (N,27,HW)
    patches = jnp.transpose(patches, (1, 0, 2)).reshape(9 * Cin, N * HW)
    patches = patches.astype(jnp.bfloat16)                             # half DMA bytes

    wk = jnp.transpose(w_oihw, (0, 2, 3, 1)).reshape(Cout, 9 * Cin)    # (kh,kw,cin)
    wk = wk.astype(jnp.bfloat16)
    b_col = bias.reshape(Cout, 1).astype(jnp.float32)

    x3f = x3.reshape(B2, C3, HW)                                       # free reshape

    kernel = functools.partial(_fused_kernel, C=Cout, C3=C3, H=H, W=W, NIMG=N)
    # TODO(synk): for large H*W, add a grid over channel/image blocks (keep the
    # full HW lane extent per block so the stride-W roll softmax stays single
    # pass), size blocks for v7x's 64 MiB physical / 32 MiB scoped VMEM with
    # double buffering, and mark the independent axis "parallel" so v7x's
    # second TensorCore gets work.  At 16x16 a single gridless launch wins.
    out_flat = pl.pallas_call(
        kernel,
        out_shape=jax.ShapeDtypeStruct((B2, 2 * Cout + C3, HW), jnp.float32),
        in_specs=[pl.BlockSpec(memory_space=pltpu.MemorySpace.VMEM)] * 4,
        out_specs=pl.BlockSpec(memory_space=pltpu.MemorySpace.VMEM),
    )(patches, wk, b_col, x3f)
    return out_flat.reshape(B2, 2 * Cout + C3, H, W)                   # free reshape


# --------------------------------- main ---------------------------------------
if __name__ == "__main__":
    key = jax.random.PRNGKey(0)
    k1, k2, k3, kw, kb = jax.random.split(key, 5)
    H = W = 16
    C_in, C_out, C3 = 3, 48, 4

    x1 = jax.random.normal(k1, (C_in, H, W), jnp.float32)       # unbatched CHW
    x2 = jax.random.normal(k2, (2, C_in, H, W), jnp.float32)
    x3 = jax.random.normal(k3, (2, C3, H, W), jnp.float32)

    # deterministic Conv2d parameters (PyTorch-style uniform init bounds)
    fan_in = C_in * 3 * 3
    bound = 1.0 / np.sqrt(fan_in)
    w = jax.random.uniform(kw, (C_out, C_in, 3, 3), jnp.float32, -bound, bound)
    b = jax.random.uniform(kb, (C_out,), jnp.float32, -bound, bound)

    out = jax.block_until_ready(jax.jit(model_forward)(x1, x2, x3, w, b))

    # pure-JAX reference of the PyTorch forward (conv at HIGHEST precision)
    def ref(x1, x2, x3, w, b):
        def conv(x):
            y = jax.lax.conv_general_dilated(
                x, w, (1, 1), ((1, 1), (1, 1)),
                dimension_numbers=("NCHW", "OIHW", "NCHW"),
                precision=jax.lax.Precision.HIGHEST)
            return y + b[None, :, None, None]
        v1 = jax.nn.sigmoid(conv(x1[None])[0])
        v2 = jax.nn.softmax(v1, axis=1)
        v3 = v2 + 1.0
        v4 = jax.nn.sigmoid(v2)
        m1 = jnp.stack([v3, v4], 0)
        v6 = jax.nn.sigmoid(conv(x2))
        v7 = jnp.concatenate([m1, v6], axis=1)
        m2 = jax.nn.sigmoid(v7)
        return jnp.concatenate([m2, x3], axis=1)

    want = ref(x1, x2, x3, w, b)
    assert out.shape == want.shape, (out.shape, want.shape)
    # 2e-3: bf16 patches/weights on the MXU + approx EUP reciprocal for the
    # softmax denominator + tanh-form sigmoid; the downstream sigmoids
    # attenuate all of these well inside this bound vs the f32-HIGHEST ref.
    np.testing.assert_allclose(np.asarray(out), np.asarray(want),
                               rtol=2e-3, atol=2e-3)
    print("KERNEL_OK")
</pallas_src>

<mosaic_0001>
module attributes {stable_mosaic.version = 11 : i64} {
  func.func @_fused_kernel(%arg0: memref<27x768xbf16, #tpu.memory_space<vmem>>, %arg1: memref<48x27xbf16, #tpu.memory_space<vmem>>, %arg2: memref<48x1xf32, #tpu.memory_space<vmem>>, %arg3: memref<2x4x256xf32, #tpu.memory_space<vmem>>, %arg4: memref<2x100x256xf32, #tpu.memory_space<vmem>>) attributes {dimension_semantics = [], scalar_prefetch = 0 : i64, scratch_operands = 0 : i64, tpu.core_type = #tpu.core_type<tc>} {
    %c0 = arith.constant 0 : index
    %c0_0 = arith.constant 0 : index
    %0 = vector.load %arg1[%c0, %c0_0] : memref<48x27xbf16, #tpu.memory_space<vmem>>, vector<48x27xbf16>
    %c0_1 = arith.constant 0 : index
    %c0_2 = arith.constant 0 : index
    %1 = vector.load %arg0[%c0_1, %c0_2] : memref<27x768xbf16, #tpu.memory_space<vmem>>, vector<27x768xbf16>
    %cst = arith.constant dense<0.000000e+00> : vector<48x768xf32>
    %2 = tpu.matmul %0, %1, %cst {dimension_numbers = #tpu.dot_dimension_numbers<[1], [0], [0], [1], [0, 0, 1, 1], [], []>} : vector<48x27xbf16>, vector<27x768xbf16>, vector<48x768xf32> -> vector<48x768xf32>
    %c0_3 = arith.constant 0 : index
    %c0_4 = arith.constant 0 : index
    %3 = vector.load %arg2[%c0_3, %c0_4] : memref<48x1xf32, #tpu.memory_space<vmem>>, vector<48x1xf32>
    %4 = vector.broadcast %3 : vector<48x1xf32> to vector<48x768xf32>
    %5 = arith.addf %2, %4 : vector<48x768xf32>
    %6 = vector.extract_strided_slice %5 {offsets = [0, 0], sizes = [48, 256], strides = [1, 1]} : vector<48x768xf32> to vector<48x256xf32>
    %cst_5 = arith.constant 5.000000e-01 : f32
    %7 = vector.broadcast %cst_5 : f32 to vector<48x256xf32>
    %8 = arith.mulf %7, %6 : vector<48x256xf32>
    %9 = math.tanh %8 : vector<48x256xf32>
    %cst_6 = arith.constant 1.000000e+00 : f32
    %10 = vector.broadcast %cst_6 : f32 to vector<48x256xf32>
    %11 = arith.addf %9, %10 : vector<48x256xf32>
    %cst_7 = arith.constant 5.000000e-01 : f32
    %12 = vector.broadcast %cst_7 : f32 to vector<48x256xf32>
    %13 = arith.mulf %12, %11 : vector<48x256xf32>
    %14 = math.exp %13 : vector<48x256xf32>
    %c16_i32 = arith.constant 16 : i32
    %15 = tpu.dynamic_rotate %14 by %c16_i32 dim 1 : vector<48x256xf32>, i32 -> vector<48x256xf32>
    %16 = arith.addf %14, %15 : vector<48x256xf32>
    %c32_i32 = arith.constant 32 : i32
    %17 = tpu.dynamic_rotate %16 by %c32_i32 dim 1 : vector<48x256xf32>, i32 -> vector<48x256xf32>
    %18 = arith.addf %16, %17 : vector<48x256xf32>
    %c64_i32 = arith.constant 64 : i32
    %19 = tpu.dynamic_rotate %18 by %c64_i32 dim 1 : vector<48x256xf32>, i32 -> vector<48x256xf32>
    %20 = arith.addf %18, %19 : vector<48x256xf32>
    %c128_i32 = arith.constant 128 : i32
    %21 = tpu.dynamic_rotate %20 by %c128_i32 dim 1 : vector<48x256xf32>, i32 -> vector<48x256xf32>
    %22 = arith.addf %20, %21 : vector<48x256xf32>
    %23 = tpu.reciprocal %22 {approx = true} : vector<48x256xf32> -> vector<48x256xf32>
    %24 = arith.mulf %14, %23 : vector<48x256xf32>
    %cst_8 = arith.constant 1.000000e+00 : f32
    %25 = vector.broadcast %cst_8 : f32 to vector<48x256xf32>
    %26 = arith.addf %24, %25 : vector<48x256xf32>
    %cst_9 = arith.constant 5.000000e-01 : f32
    %27 = vector.broadcast %cst_9 : f32 to vector<48x256xf32>
    %28 = arith.mulf %27, %26 : vector<48x256xf32>
    %29 = math.tanh %28 : vector<48x256xf32>
    %cst_10 = arith.constant 1.000000e+00 : f32
    %30 = vector.broadcast %cst_10 : f32 to vector<48x256xf32>
    %31 = arith.addf %29, %30 : vector<48x256xf32>
    %cst_11 = arith.constant 5.000000e-01 : f32
    %32 = vector.broadcast %cst_11 : f32 to vector<48x256xf32>
    %33 = arith.mulf %32, %31 : vector<48x256xf32>
    %c0_12 = arith.constant 0 : index
    %c0_13 = arith.constant 0 : index
    %c0_14 = arith.constant 0 : index
    %34 = vector.load %arg4[%c0_12, %c0_13, %c0_14] : memref<2x100x256xf32, #tpu.memory_space<vmem>>, vector<1x48x256xf32>
    %35 = vector.shape_cast %34 : vector<1x48x256xf32> to vector<48x256xf32>
    %36 = vector.shape_cast %33 : vector<48x256xf32> to vector<1x48x256xf32>
    tpu.vector_store %arg4[%c0_12, %c0_13, %c0_14], %36 {strides = array<i32>} : memref<2x100x256xf32, #tpu.memory_space<vmem>>, vector<1x48x256xf32>,
    %cst_15 = arith.constant 5.000000e-01 : f32
    %37 = vector.broadcast %cst_15 : f32 to vector<48x256xf32>
    %38 = arith.mulf %37, %24 : vector<48x256xf32>
    %39 = math.tanh %38 : vector<48x256xf32>
    %cst_16 = arith.constant 1.000000e+00 : f32
    %40 = vector.broadcast %cst_16 : f32 to vector<48x256xf32>
    %41 = arith.addf %39, %40 : vector<48x256xf32>
    %cst_17 = arith.constant 5.000000e-01 : f32
    %42 = vector.broadcast %cst_17 : f32 to vector<48x256xf32>
    %43 = arith.mulf %42, %41 : vector<48x256xf32>
    %cst_18 = arith.constant 5.000000e-01 : f32
    %44 = vector.broadcast %cst_18 : f32 to vector<48x256xf32>
    %45 = arith.mulf %44, %43 : vector<48x256xf32>
    %46 = math.tanh %45 : vector<48x256xf32>
    %cst_19 = arith.constant 1.000000e+00 : f32
    %47 = vector.broadcast %cst_19 : f32 to vector<48x256xf32>
    %48 = arith.addf %46, %47 : vector<48x256xf32>
    %cst_20 = arith.constant 5.000000e-01 : f32
    %49 = vector.broadcast %cst_20 : f32 to vector<48x256xf32>
    %50 = arith.mulf %49, %48 : vector<48x256xf32>
    %c1 = arith.constant 1 : index
    %c0_21 = arith.constant 0 : index
    %c0_22 = arith.constant 0 : index
    %51 = vector.load %arg4[%c1, %c0_21, %c0_22] : memref<2x100x256xf32, #tpu.memory_space<vmem>>, vector<1x48x256xf32>
    %52 = vector.shape_cast %51 : vector<1x48x256xf32> to vector<48x256xf32>
    %53 = vector.shape_cast %50 : vector<48x256xf32> to vector<1x48x256xf32>
    tpu.vector_store %arg4[%c1, %c0_21, %c0_22], %53 {strides = array<i32>} : memref<2x100x256xf32, #tpu.memory_space<vmem>>, vector<1x48x256xf32>,
    %54 = vector.extract_strided_slice %5 {offsets = [0, 256], sizes = [48, 512], strides = [1, 1]} : vector<48x768xf32> to vector<48x512xf32>
    %cst_23 = arith.constant 5.000000e-01 : f32
    %55 = vector.broadcast %cst_23 : f32 to vector<48x512xf32>
    %56 = arith.mulf %55, %54 : vector<48x512xf32>
    %57 = math.tanh %56 : vector<48x512xf32>
    %cst_24 = arith.constant 1.000000e+00 : f32
    %58 = vector.broadcast %cst_24 : f32 to vector<48x512xf32>
    %59 = arith.addf %57, %58 : vector<48x512xf32>
    %cst_25 = arith.constant 5.000000e-01 : f32
    %60 = vector.broadcast %cst_25 : f32 to vector<48x512xf32>
    %61 = arith.mulf %60, %59 : vector<48x512xf32>
    %cst_26 = arith.constant 5.000000e-01 : f32
    %62 = vector.broadcast %cst_26 : f32 to vector<48x512xf32>
    %63 = arith.mulf %62, %61 : vector<48x512xf32>
    %64 = math.tanh %63 : vector<48x512xf32>
    %cst_27 = arith.constant 1.000000e+00 : f32
    %65 = vector.broadcast %cst_27 : f32 to vector<48x512xf32>
    %66 = arith.addf %64, %65 : vector<48x512xf32>
    %cst_28 = arith.constant 5.000000e-01 : f32
    %67 = vector.broadcast %cst_28 : f32 to vector<48x512xf32>
    %68 = arith.mulf %67, %66 : vector<48x512xf32>
    %69 = vector.extract_strided_slice %68 {offsets = [0, 0], sizes = [48, 256], strides = [1, 1]} : vector<48x512xf32> to vector<48x256xf32>
    %c0_29 = arith.constant 0 : index
    %c48 = arith.constant 48 : index
    %c0_30 = arith.constant 0 : index
    %70 = vector.load %arg4[%c0_29, %c48, %c0_30] : memref<2x100x256xf32, #tpu.memory_space<vmem>>, vector<1x48x256xf32>
    %71 = vector.shape_cast %70 : vector<1x48x256xf32> to vector<48x256xf32>
    %72 = vector.shape_cast %69 : vector<48x256xf32> to vector<1x48x256xf32>
    tpu.vector_store %arg4[%c0_29, %c48, %c0_30], %72 {strides = array<i32>} : memref<2x100x256xf32, #tpu.memory_space<vmem>>, vector<1x48x256xf32>,
    %73 = vector.extract_strided_slice %68 {offsets = [0, 256], sizes = [48, 256], strides = [1, 1]} : vector<48x512xf32> to vector<48x256xf32>
    %c1_31 = arith.constant 1 : index
    %c48_32 = arith.constant 48 : index
    %c0_33 = arith.constant 0 : index
    %74 = vector.load %arg4[%c1_31, %c48_32, %c0_33] : memref<2x100x256xf32, #tpu.memory_space<vmem>>, vector<1x48x256xf32>
    %75 = vector.shape_cast %74 : vector<1x48x256xf32> to vector<48x256xf32>
    %76 = vector.shape_cast %73 : vector<48x256xf32> to vector<1x48x256xf32>
    tpu.vector_store %arg4[%c1_31, %c48_32, %c0_33], %76 {strides = array<i32>} : memref<2x100x256xf32, #tpu.memory_space<vmem>>, vector<1x48x256xf32>,
    %c0_34 = arith.constant 0 : index
    %c0_35 = arith.constant 0 : index
    %c0_36 = arith.constant 0 : index
    %77 = vector.load %arg3[%c0_34, %c0_35, %c0_36] : memref<2x4x256xf32, #tpu.memory_space<vmem>>, vector<2x4x256xf32>
    %c0_37 = arith.constant 0 : index
    %c96 = arith.constant 96 : index
    %c0_38 = arith.constant 0 : index
    %78 = vector.load %arg4[%c0_37, %c96, %c0_38] : memref<2x100x256xf32, #tpu.memory_space<vmem>>, vector<2x4x256xf32>
    tpu.vector_store %arg4[%c0_37, %c96, %c0_38], %77 {strides = array<i32>} : memref<2x100x256xf32, #tpu.memory_space<vmem>>, vector<2x4x256xf32>,
    return
  }
}

</mosaic_0001>

<bundles_post_ra>
// kernel: model_forward.1
= control target key start
LH: loop header
LB: loop body
LE: loop exit
PB: predicated region body
PF: predicated region fallthrough
CT: control target
= control target key end

     0   :  { %vm151_vm0 = vcmask 1044480   ;;  %vm152_vm1 = vcmask 1045504   ;;  %v1330_v1 = vmov 65535   ;;  %v1331_v3 = vmov 0   ;;  %s1333_s22 = smov 32   ;;  %s1909_s0 = inlined_call_operand.vmem [shape: bf16[27,768], index: 0, kind: input, shape index: {}]   ;;  %s1910_s1 = inlined_call_operand.vmem [shape: bf16[48,27], index: 1, kind: input, shape index: {}]   ;;  %s1911_s2 = inlined_call_operand.vmem [shape: f32[48,1], index: 2, kind: input, shape index: {}]   ;;  %s1912_s4 = inlined_call_operand.vmem [shape: f32[2,100,256], index: 4, kind: output, shape index: {}]   ;;  %s1913_s3 = inlined_call_operand.vmem [shape: f32[2,4,256], index: 3, kind: input, shape index: {}]  }
   0x1   :  { %v1079_v0 = vld [vmem:[%s1909_s0 + $0x4] ss:$24 sps:$4 sm:$0xff]   ;;  %v153_v2 = vsel %vm151_vm0, 4294967295, %v1330_v1  ;;  %205 = vmatprep.mubr.bf16.mxu0 %v1331_v3  ;;  %215 = vmatprep.mubr.bf16.mxu1 %v1331_v3  ;;  %v1081_v4 = vld [vmem:[%s1909_s0] ss:$24 sps:$4 sm:$0xff]   ;;  %v1086_v11 = vld [vmem:[%s1910_s1 + $0x8] sm:$0xff]  }
   0x2   :  { %v154_v5 = vsel %vm152_vm1, %v153_v2, 0  ;;  %1077 = vset.pattern.permute.xlu0 %v1331_v3  ;;  %1078 = vset.pattern.permute.xlu1 %v1331_v3  ;;  %v1082_v6 = vld [vmem:[%s1909_s0 + $0x34] ss:$24 sps:$4 sm:$0x3f]   ;;  %v1085_v10 = vld [vmem:[%s1910_s1] sm:$0xff]   ;;  %vm141_vm2 = vcmask 220160  }
   0x3   :  { %173 = vmatprep.subr.bf16.mxu0 %v1079_v0  ;;  %1068 = vmatprep.subr.bf16.mxu1 %v1079_v0  ;;  %v1084_v7 = vld [vmem:[%s1909_s0 + $0x30] ss:$24 sps:$4 sm:$0x3f]   ;;  %v159_v8 = vand.u32 %v1082_v6, %v154_v5  ;;  %v1089_v13 = vld [vmem:[%s1909_s0 + $0x14] ss:$24 sps:$4 sm:$0xff]   ;;  %v36_v22 = vld [vmem:[%s1911_s2] sm:$0xff] }
   0x4   :  { %174 = vmatpush1.bf16.msra.mxu0 %v1081_v4  ;;  %1070 = vmatpush1.bf16.msra.mxu1 %v1081_v4  ;;  %v156_v9 = vand.u32 %v1084_v7, %v154_v5  ;;  %v1087_v12 = vld [vmem:[%s1909_s0 + $0x10] ss:$24 sps:$4 sm:$0xff]   ;;  %v1090_v14 = vld [vmem:[%s1909_s0 + $0x40] ss:$24 sps:$4 sm:$0x3f]  }
   0x5   :  { %175 = vmatprep.subr.bf16.mxu0 %v159_v8  ;;  %1069 = vmatprep.subr.bf16.mxu1 %v159_v8  ;;  %v1092_v15 = vld [vmem:[%s1909_s0 + $0x44] ss:$24 sps:$4 sm:$0x3f]   ;;  %v1094_v17 = vld [vmem:[%s1909_s0 + $0x8] ss:$24 sps:$4 sm:$0xff]   ;;  %v168_v19 = vand.u32 %v1090_v14, %v154_v5  ;;  %v38_v23 = vld [vmem:[%s1911_s2 + $0x10] sm:$0xff] }
   0x6   :  { %v171_v16 = vand.u32 %v1092_v15, %v154_v5  ;;  %v1096_v18 = vld [vmem:[%s1909_s0 + $0xc] ss:$24 sps:$4 sm:$0xff]   ;;  %v1097_v20 = vld [vmem:[%s1909_s0 + $0x38] ss:$24 sps:$4 sm:$0x3f]   ;;  %44 = vperm.xlu0 %1077, %v36_v22   ;;  %54 = vperm.xlu1 %1078, %v38_v23  }
   0x7   :  { %v1099_v21 = vld [vmem:[%s1909_s0 + $0x3c] ss:$24 sps:$4 sm:$0x3f]   ;;  %v37_v26 = vld [vmem:[%s1911_s2 + $0x8] sm:$0xff]  ;;  %v162_v27 = vand.u32 %v1097_v20, %v154_v5  ;;  %v40_v29 = vld [vmem:[%s1911_s2 + $0x20] sm:$0xff]  ;;  %s1334_s0 = smov 64  }
   0x8   :  { %176 = vmatpush1.bf16.msra.mxu0 %v156_v9  ;;  %1071 = vmatpush1.bf16.msra.mxu1 %v156_v9  ;;  %v165_v24 = vand.u32 %v1099_v21, %v154_v5  ;;  %v1093_v25 = vld [vmem:[%s1910_s1 + $0x10] sm:$0xff]   ;;  %v39_v28 = vld [vmem:[%s1911_s2 + $0x18] sm:$0xff]  ;;  %v41_v30 = vld [vmem:[%s1911_s2 + $0x28] sm:$0xff]  ;;  %s1332_s2 = smov 16  }
   0x9   :  { %299 = vmatprep.subr.bf16.mxu0 %v1089_v13  ;;  %236 = vmatprep.subr.bf16.mxu1 %v1096_v18 }
   0xa   :  { %49 = vperm.xlu0 %1077, %v37_v26   ;;  %59 = vperm.xlu1 %1078, %v39_v28  }
   0xb   :  { %1035 = vmatmul.mubr.msk.bf16.vlgmr.msra.gmra.mrb[0].mxu0 %vm141_vm2, %v1085_v10  ;;  %1036 = vmatmul.mubr.msk.bf16.vlgmr.msra.gmra.mrb[0].mxu1 %vm141_vm2, %v1086_v11 }
   0xc   :  { %300 = vmatpush1.bf16.msra.mxu0 %v1087_v12  ;;  %225 = vmatprep.mubr.bf16.mxu1 %v1331_v3 }
   0xd   :  { %301 = vmatprep.subr.bf16.mxu0 %v171_v16  ;;  %331 = vmatprep.mubr.bf16.mxu0 %v1331_v3 }
   0xe   :  { %237 = vmatpush1.bf16.msra.mxu1 %v1094_v17  ;;  %64 = vperm.xlu0 %1077, %v40_v29  }
   0xf   :  { %238 = vmatprep.subr.bf16.mxu1 %v165_v24  ;;  %69 = vperm.xlu1 %1078, %v41_v30  }
  0x10   :  { %302 = vmatpush1.bf16.msra.mxu0 %v168_v19 }
  0x12   :  { %239 = vmatpush1.bf16.msra.mxu1 %v162_v27 }
  0x13   :  { %1037 = vmatmul.mubr.msk.bf16.gmra.mrb[4].mxu1 %vm141_vm2, %v1093_v25  ;;  %1041 = vmatmul.mubr.msk.bf16.vlgmr.msra.gmra.mrb[4].mxu0 %vm141_vm2, %v1085_v10 }
  0x14   :  { %268 = vmatprep.mubr.bf16.mxu1 %v1331_v3  ;;  %341 = vmatprep.mubr.bf16.mxu0 %v1331_v3 }
  0x1b   :  { %1038 = vmatmul.mubr.msk.bf16.vlgmr.msra.gmra.mrb[8].mxu1 %vm141_vm2, %v1085_v10  ;;  %1042 = vmatmul.mubr.msk.bf16.gmra.mrb[8].mxu0 %vm141_vm2, %v1086_v11 }
  0x1c   :  { %278 = vmatprep.mubr.bf16.mxu1 %v1331_v3  ;;  %351 = vmatprep.mubr.bf16.mxu0 %v1331_v3 }
  0x23   :  { %1039 = vmatmul.mubr.msk.bf16.gmra.mrb[12].mxu1 %vm141_vm2, %v1086_v11  ;;  %1043 = vmatmul.mubr.msk.bf16.gmra.mrb[12].mxu0 %vm141_vm2, %v1093_v25 }
  0x24   :  { %288 = vmatprep.mubr.bf16.mxu1 %v1331_v3 }
  0x2b   :  { %1040 = vmatmul.mubr.msk.bf16.gmra.mrb[16].mxu1 %vm141_vm2, %v1093_v25 }
  0x85   :  { %v1443_v31 = vpop.permute.xlu0 %44  ;;  %v1445_v32 = vpop.permute.xlu1 %54 }
  0x89   :  { %v1447_v33 = vpop.permute.xlu0 %49  ;;  %v1449_v34 = vpop.permute.xlu1 %59 }
  0x8d   :  { %v1459_v57 = vpop.permute.xlu0 %64 }
  0x8e   :  { %v1461_v58 = vpop.permute.xlu1 %69 }
  0xde   :  { %v207_v35 = vpop.f32.mrb[0].mxu0  ;;  %v217_v36 = vpop.f32.mrb[0].mxu1 }
  0xdf   :  { %v208_v37 = vadd.f32 %v207_v35, %v1443_v31  ;;  %v218_v38 = vadd.f32 %v217_v36, %v1445_v32  ;;  %v209_v39 = vpop.f32.mrb[1].mxu0  ;;  %v219_v40 = vpop.f32.mrb[1].mxu1 }
  0xe0   :  { %v210_v41 = vadd.f32 %v209_v39, %v1443_v31  ;;  %v220_v42 = vadd.f32 %v219_v40, %v1445_v32  ;;  %v211_v43 = vpop.f32.mrb[2].mxu0  ;;  %v221_v44 = vpop.f32.mrb[2].mxu1 }
  0xe1   :  { %v362_v45 = vmul.f32 0.5, %v208_v37  ;;  %v366_v46 = vmul.f32 0.5, %v218_v38  ;;  %v212_v47 = vadd.f32 %v211_v43, %v1447_v33  ;;  %v222_v48 = vadd.f32 %v221_v44, %v1449_v34  ;;  %v213_v49 = vpop.f32.mrb[3].mxu0  ;;  %v223_v50 = vpop.f32.mrb[3].mxu1 }
  0xe2   :  { %v363_v51 = vmul.f32 0.5, %v210_v41  ;;  %v367_v52 = vmul.f32 0.5, %v220_v42  ;;  %v214_v53 = vadd.f32 %v213_v49, %v1447_v33  ;;  %v224_v54 = vadd.f32 %v223_v50, %v1449_v34 }
  0xe3   :  { %1102 = vtanh.f32 %v362_v45  ;;  %v364_v55 = vmul.f32 0.5, %v212_v47  ;;  %v368_v56 = vmul.f32 0.5, %v222_v48 }
  0xe4   :  { %1104 = vtanh.f32 %v366_v46  ;;  %v365_v59 = vmul.f32 0.5, %v214_v53  ;;  %v369_v60 = vmul.f32 0.5, %v224_v54 }
  0xe5   :  { %1106 = vtanh.f32 %v363_v51 }
  0xe6   :  { %1108 = vtanh.f32 %v367_v52  ;;  %v227_v61 = vpop.f32.mrb[4].mxu1  ;;  %v333_v62 = vpop.f32.mrb[4].mxu0 }
  0xe7   :  { %1110 = vtanh.f32 %v364_v55  ;;  %v228_v63 = vadd.f32 %v227_v61, %v1459_v57  ;;  %v334_v0 = vadd.f32 %v333_v62, %v1443_v31  ;;  %v229_v1 = vpop.f32.mrb[5].mxu1  ;;  %v335_v2 = vpop.f32.mrb[5].mxu0 }
  0xe8   :  { %1112 = vtanh.f32 %v368_v56  ;;  %v230_v3 = vadd.f32 %v229_v1, %v1459_v57  ;;  %v336_v4 = vadd.f32 %v335_v2, %v1443_v31  ;;  %v231_v5 = vpop.f32.mrb[6].mxu1  ;;  %v337_v6 = vpop.f32.mrb[6].mxu0 }
  0xe9   :  { %1114 = vtanh.f32 %v365_v59  ;;  %v370_v7 = vmul.f32 0.5, %v228_v63  ;;  %v790_v8 = vmul.f32 0.5, %v334_v0  ;;  %v232_v9 = vadd.f32 %v231_v5, %v1461_v58  ;;  %v233_v10 = vpop.f32.mrb[7].mxu1  ;;  %v339_v11 = vpop.f32.mrb[7].mxu0 }
  0xea   :  { %1116 = vtanh.f32 %v369_v60  ;;  %v371_v12 = vmul.f32 0.5, %v230_v3  ;;  %v791_v13 = vmul.f32 0.5, %v336_v4  ;;  %v338_v14 = vadd.f32 %v337_v6, %v1447_v33 }
  0xeb   :  { %1118 = vtanh.f32 %v370_v7  ;;  %v372_v15 = vmul.f32 0.5, %v232_v9  ;;  %v234_v16 = vadd.f32 %v233_v10, %v1461_v58  ;;  %v340_v17 = vadd.f32 %v339_v11, %v1447_v33 }
  0xec   :  { %1120 = vtanh.f32 %v790_v8  ;;  %v794_v18 = vmul.f32 0.5, %v338_v14 }
  0xed   :  { %v1103_v19 = vpop.eup %1102  ;;  %1122 = vtanh.f32 %v371_v12  ;;  %v373_v20 = vmul.f32 0.5, %v234_v16  ;;  %v795_v23 = vmul.f32 0.5, %v340_v17 }
  0xee   :  { %v1105_v21 = vpop.eup %1104  ;;  %v386_v22 = vadd.f32 1.0, %v1103_v19  ;;  %1124 = vtanh.f32 %v791_v13  ;;  %v270_v24 = vpop.f32.mrb[8].mxu1 }
  0xef   :  { %v343_v25 = vpop.f32.mrb[8].mxu0  ;;  %v1107_v26 = vpop.eup %1106  ;;  %v390_v27 = vadd.f32 1.0, %v1105_v21  ;;  %1126 = vtanh.f32 %v372_v15  ;;  %v271_v28 = vadd.f32 %v270_v24, %v1443_v31 }
  0xf0   :  { %v1473_v29 = vadd.f32 %v343_v25, %v1445_v32  ;;  %v272_v30 = vpop.f32.mrb[9].mxu1  ;;  %v1475_v35 = vpop.f32.mrb[9].mxu0  ;;  %v398_v37 = vmul.f32 0.5, %v386_v22  ;;  %v387_v38 = vadd.f32 1.0, %v1107_v26  ;;  %1128 = vtanh.f32 %v794_v18 }
  0xf1   :  { %v1109_v36 = vpop.eup %1108  ;;  %v1478_v39 = vadd.f32 %v272_v30, %v1443_v31  ;;  %v1480_v40 = vpop.f32.mrb[10].mxu1  ;;  %v402_v43 = vmul.f32 0.5, %v390_v27  ;;  %1130 = vtanh.f32 %v373_v20  ;;  %v788_v45 = vmul.f32 0.5, %v271_v28 }
  0xf2   :  { %v1482_v41 = vpop.f32.mrb[10].mxu0  ;;  %v1111_v42 = vpop.eup %1110  ;;  %v391_v44 = vadd.f32 1.0, %v1109_v36  ;;  %v410_v49 = vmul.f32 1.442695, %v398_v37  ;;  %v399_v50 = vmul.f32 0.5, %v387_v38  ;;  %1132 = vtanh.f32 %v795_v23 }
  0xf3   :  { %v1484_v46 = vpop.f32.mrb[11].mxu1  ;;  %v1486_v47 = vpop.f32.mrb[11].mxu0  ;;  %v388_v51 = vadd.f32 1.0, %v1111_v42  ;;  %v418_v52 = vmul.f32 1.442695, %v402_v43  ;;  %1134 = vtanh.f32 %v788_v45 }
  0xf4   :  { %v1113_v48 = vpop.eup %1112  ;;  %v403_v53 = vmul.f32 0.5, %v391_v44  ;;  %1136 = vpow2.f32 %v410_v49  ;;  %v412_v56 = vmul.f32 1.442695, %v399_v50 }
  0xf5   :  { %v1115_v31 = vpop.eup %1114  ;;  %v392_v54 = vadd.f32 1.0, %v1113_v48  ;;  %v400_v59 = vmul.f32 0.5, %v388_v51  ;;  %1138 = vpow2.f32 %v418_v52 }
  0xf6   :  { %v1117_v55 = vpop.eup %1116  ;;  %v389_v60 = vadd.f32 1.0, %v1115_v31  ;;  %v420_v62 = vmul.f32 1.442695, %v403_v53  ;;  %1140 = vpow2.f32 %v412_v56  ;;  %v1488_v5 = vpop.f32.mrb[12].mxu1 }
  0xf7   :  { %v1119_v61 = vpop.eup %1118  ;;  %v404_v63 = vmul.f32 0.5, %v392_v54  ;;  %v393_v0 = vadd.f32 1.0, %v1117_v55  ;;  %v414_v2 = vmul.f32 1.442695, %v400_v59  ;;  %v1490_v6 = vpop.f32.mrb[12].mxu0 }
  0xf8   :  { %v1121_v1 = vpop.eup %1120  ;;  %v401_v3 = vmul.f32 0.5, %v389_v60  ;;  %v394_v4 = vadd.f32 1.0, %v1119_v61  ;;  %1142 = vpow2.f32 %v420_v62  ;;  %v1492_v11 = vpop.f32.mrb[13].mxu1  ;;  %v798_v61 = vmul.f32 0.5, %v1473_v29 }
  0xf9   :  { %v1123_v7 = vpop.eup %1122  ;;  %v422_v8 = vmul.f32 1.442695, %v404_v63  ;;  %v405_v9 = vmul.f32 0.5, %v393_v0  ;;  %v838_v10 = vadd.f32 1.0, %v1121_v1  ;;  %v1494_v12 = vpop.f32.mrb[13].mxu0  ;;  %1144 = vpow2.f32 %v414_v2 }
  0xfa   :  { %v1125_v13 = vpop.eup %1124  ;;  %v416_v14 = vmul.f32 1.442695, %v401_v3  ;;  %v406_v15 = vmul.f32 0.5, %v394_v4  ;;  %v395_v16 = vadd.f32 1.0, %v1123_v7  ;;  %v1496_v17 = vpop.f32.mrb[14].mxu1  ;;  %v789_v2 = vmul.f32 0.5, %v1478_v39 }
  0xfb   :  { %v1498_v18 = vpop.f32.mrb[14].mxu0  ;;  %v1127_v19 = vpop.eup %1126  ;;  %1146 = vpow2.f32 %v422_v8  ;;  %v424_v20 = vmul.f32 1.442695, %v405_v9  ;;  %v862_v21 = vmul.f32 0.5, %v838_v10  ;;  %v839_v22 = vadd.f32 1.0, %v1125_v13 }
  0xfc   :  { %v1500_v23 = vpop.f32.mrb[15].mxu1  ;;  %v1502_v24 = vpop.f32.mrb[15].mxu0  ;;  %1148 = vpow2.f32 %v416_v14  ;;  %v426_v26 = vmul.f32 1.442695, %v406_v15  ;;  %v407_v27 = vmul.f32 0.5, %v395_v16  ;;  %v396_v28 = vadd.f32 1.0, %v1127_v19 }
  0xfd   :  { %v1129_v25 = vpop.eup %1128  ;;  %1150 = vpow2.f32 %v424_v20  ;;  %v886_v36 = vmul.f32 0.5, %v862_v21  ;;  %v863_v37 = vmul.f32 0.5, %v839_v22  ;;  %v346_v29 = vadd.f32 %v1475_v35, %v1445_v32 }
  0xfe   :  { %v1131_v30 = vpop.eup %1130  ;;  %v842_v38 = vadd.f32 1.0, %v1129_v25  ;;  %1152 = vpow2.f32 %v426_v26  ;;  %v428_v43 = vmul.f32 1.442695, %v407_v27  ;;  %v408_v44 = vmul.f32 0.5, %v396_v28  ;;  %v1506_v55 = vpop.f32.mrb[16].mxu1 }
  0xff   :  { %v1133_v42 = vpop.eup %1132  ;;  %v397_v45 = vadd.f32 1.0, %v1131_v30  ;;  %1154 = vtanh.f32 %v886_v36  ;;  %v887_v49 = vmul.f32 0.5, %v863_v37  ;;  %v1511_v62 = vpop.f32.mrb[17].mxu1  ;;  %v275_v8 = vadd.f32 %v1480_v40, %v1447_v33 }
 0x100   :  { %v1135_v48 = vpop.eup %1134  ;;  %v866_v50 = vmul.f32 0.5, %v842_v38  ;;  %v843_v51 = vadd.f32 1.0, %v1133_v42  ;;  %1156 = vpow2.f32 %v428_v43  ;;  %v430_v52 = vmul.f32 1.442695, %v408_v44  ;;  %v1518_v3 = vpop.f32.mrb[18].mxu1 }
 0x101   :  { %v1504_v31 = vpop.eup %1136  ;;  %v409_v53 = vmul.f32 0.5, %v397_v45  ;;  %v836_v54 = vadd.f32 1.0, %v1135_v48  ;;  %1158 = vtanh.f32 %v887_v49  ;;  %v1526_v9 = vpop.f32.mrb[19].mxu1  ;;  %v348_v39 = vadd.f32 %v1482_v41, %v1449_v34 }
 0x102   :  { %v1508_v56 = vpop.eup %1138  ;;  %v890_v59 = vmul.f32 0.5, %v866_v50  ;;  %v867_v60 = vmul.f32 0.5, %v843_v51  ;;  %434 = vrot.lane.b32.xlu0 %v1504_v31, %s1332_s2  ;;  %1160 = vpow2.f32 %v430_v52  ;;  %v277_v14 = vadd.f32 %v1484_v46, %v1447_v33 }
 0x103   :  { %v1515_v63 = vpop.eup %1140  ;;  %v432_v0 = vmul.f32 1.442695, %v409_v53  ;;  %v860_v1 = vmul.f32 0.5, %v836_v54  ;;  %v799_v16 = vmul.f32 0.5, %v346_v29  ;;  %v350_v35 = vadd.f32 %v1486_v47, %v1449_v34 }
 0x104   :  { %v1520_v4 = vpop.eup %1142  ;;  %1162 = vtanh.f32 %v890_v59  ;;  %v891_v7 = vmul.f32 0.5, %v867_v60  ;;  %v792_v41 = vmul.f32 0.5, %v275_v8  ;;  %v281_v33 = vadd.f32 %v1488_v5, %v1445_v32 }
 0x105   :  { %v1528_v10 = vpop.eup %1144  ;;  %1164 = vpow2.f32 %v432_v0  ;;  %v884_v13 = vmul.f32 0.5, %v860_v1  ;;  %v802_v19 = vmul.f32 0.5, %v348_v39  ;;  %v354_v47 = vadd.f32 %v1490_v6, %v1459_v57 }
 0x106   :  { %v1534_v15 = vpop.eup %1146  ;;  %1166 = vtanh.f32 %v891_v7  ;;  %436 = vrot.lane.b32.xlu1 %v1528_v10, %s1332_s2  ;;  %438 = vrot.lane.b32.xlu0 %v1508_v56, %s1332_s2  ;;  %v793_v21 = vmul.f32 0.5, %v277_v14  ;;  %v283_v22 = vadd.f32 %v1492_v11, %v1445_v32  ;;  %v803_v26 = vmul.f32 0.5, %v350_v35 }
 0x107   :  { %v1542_v40 = vpop.eup %1148  ;;  %1168 = vtanh.f32 %v884_v13  ;;  %v356_v5 = vadd.f32 %v1494_v12, %v1459_v57  ;;  %v285_v27 = vadd.f32 %v1496_v17, %v1449_v34  ;;  %v796_v32 = vmul.f32 0.5, %v281_v33 }
 0x108   :  { %v1546_v46 = vpop.eup %1150  ;;  %1170 = vtanh.f32 %v798_v61  ;;  %v806_v30 = vmul.f32 0.5, %v354_v47  ;;  %v358_v12 = vadd.f32 %v1498_v18, %v1461_v58  ;;  %v287_v17 = vadd.f32 %v1500_v23, %v1449_v34 }
 0x109   :  { %v1550_v20 = vpop.eup %1152  ;;  %1172 = vtanh.f32 %v789_v2  ;;  %v797_v42 = vmul.f32 0.5, %v283_v22  ;;  %v807_v44 = vmul.f32 0.5, %v356_v5  ;;  %v800_v45 = vmul.f32 0.5, %v285_v27 }
 0x10a   :  { %v1155_v25 = vpop.eup %1154  ;;  %1174 = vtanh.f32 %v799_v16  ;;  %440 = vrot.lane.b32.xlu1 %v1534_v15, %s1332_s2  ;;  %446 = vrot.lane.b32.xlu0 %v1515_v63, %s1332_s2  ;;  %v360_v48 = vadd.f32 %v1502_v24, %v1461_v58  ;;  %v291_v49 = vadd.f32 %v1506_v55, %v1459_v57  ;;  %v810_v24 = vmul.f32 0.5, %v358_v12 }
 0x10b   :  { %v1562_v6 = vpop.eup %1156  ;;  %v934_v28 = vadd.f32 1.0, %v1155_v25  ;;  %1176 = vtanh.f32 %v792_v41  ;;  %v801_v51 = vmul.f32 0.5, %v287_v17  ;;  %v293_v52 = vadd.f32 %v1511_v62, %v1459_v57 }
 0x10c   :  { %v1159_v11 = vpop.eup %1158  ;;  %1178 = vtanh.f32 %v802_v19  ;;  %v295_v60 = vadd.f32 %v1518_v3, %v1461_v58  ;;  %v811_v0 = vmul.f32 0.5, %v360_v48  ;;  %v297_v1 = vadd.f32 %v1526_v9, %v1461_v58 }
 0x10d   :  { %v1568_v36 = vpop.eup %1160  ;;  %v958_v37 = vmul.f32 0.5, %v934_v28  ;;  %v935_v38 = vadd.f32 1.0, %v1159_v11  ;;  %1180 = vtanh.f32 %v793_v21  ;;  %v804_v3 = vmul.f32 0.5, %v291_v49 }
 0x10e   :  { %v1163_v43 = vpop.eup %1162  ;;  %1182 = vtanh.f32 %v803_v26  ;;  %448 = vrot.lane.b32.xlu1 %v1542_v40, %s1332_s2  ;;  %450 = vrot.lane.b32.xlu0 %v1520_v4, %s1332_s2  ;;  %v805_v58 = vmul.f32 0.5, %v293_v52  ;;  %v1602_v14 = vmul.f32 0.5, %v295_v60  ;;  %v1607_v33 = vmul.f32 0.5, %v297_v1 }
 0x10f   :  { %v1576_v34 = vpop.eup %1164  ;;  %1056 = vst [vmem:[%s1912_s4 + $0x130] sm:$0xff] %v958_v37  ;;  %v959_v18 = vmul.f32 0.5, %v935_v38  ;;  %v938_v23 = vadd.f32 1.0, %v1163_v43  ;;  %1184 = vtanh.f32 %v796_v32 }
 0x110   :  { %v1167_v50 = vpop.eup %1166  ;;  %1186 = vtanh.f32 %v806_v30 }
 0x111   :  { %v1169_v53 = vpop.eup %1168  ;;  %1057 = vst [vmem:[%s1912_s4 + $0x138] sm:$0xff] %v959_v18  ;;  %v962_v54 = vmul.f32 0.5, %v938_v23  ;;  %v939_v59 = vadd.f32 1.0, %v1167_v50  ;;  %1188 = vtanh.f32 %v797_v42 }
 0x112   :  { %v1171_v61 = vpop.eup %1170  ;;  %v932_v55 = vadd.f32 1.0, %v1169_v53  ;;  %1190 = vtanh.f32 %v807_v44  ;;  %452 = vrot.lane.b32.xlu1 %v1546_v46, %s1332_s2  ;;  %442 = vrot.lane.b32.xlu0 %v1550_v20, %s1332_s2 }
 0x113   :  { %v1173_v57 = vpop.eup %1172  ;;  %1058 = vst [vmem:[%s1912_s4 + $0x140] sm:$0xff] %v962_v54  ;;  %v963_v62 = vmul.f32 0.5, %v939_v59  ;;  %v846_v2 = vadd.f32 1.0, %v1171_v61  ;;  %1192 = vtanh.f32 %v800_v45 }
 0x114   :  { %v1175_v7 = vpop.eup %1174  ;;  %v956_v29 = vmul.f32 0.5, %v932_v55  ;;  %v837_v8 = vadd.f32 1.0, %v1173_v57  ;;  %1194 = vtanh.f32 %v810_v24 }
 0x115   :  { %v1177_v9 = vpop.eup %1176  ;;  %1059 = vst [vmem:[%s1912_s4 + $0x148] sm:$0xff] %v963_v62  ;;  %v870_v13 = vmul.f32 0.5, %v846_v2  ;;  %v847_v39 = vadd.f32 1.0, %v1175_v7  ;;  %1196 = vtanh.f32 %v801_v51 }
 0x116   :  { %v1179_v16 = vpop.eup %1178  ;;  %980 = vst [vmem:[%s1912_s4 + $0x60] sm:$0xff] %v956_v29  ;;  %v861_v35 = vmul.f32 0.5, %v837_v8  ;;  %v840_v41 = vadd.f32 1.0, %v1177_v9  ;;  %1198 = vtanh.f32 %v811_v0  ;;  %444 = vrot.lane.b32.xlu1 %v1568_v36, %s1332_s2  ;;  %454 = vrot.lane.b32.xlu0 %v1562_v6, %s1332_s2 }
 0x117   :  { %v1181_v19 = vpop.eup %1180  ;;  %v894_v47 = vmul.f32 0.5, %v870_v13  ;;  %v871_v21 = vmul.f32 0.5, %v847_v39  ;;  %v850_v22 = vadd.f32 1.0, %v1179_v16  ;;  %1200 = vtanh.f32 %v804_v3 }
 0x118   :  { %v1183_v25 = vpop.eup %1182  ;;  %v885_v26 = vmul.f32 0.5, %v861_v35  ;;  %v864_v5 = vmul.f32 0.5, %v840_v41  ;;  %v841_v27 = vadd.f32 1.0, %v1181_v19  ;;  %1202 = vtanh.f32 %v805_v58 }
 0x119   :  { %v1185_v28 = vpop.eup %1184  ;;  %1204 = vtanh.f32 %v894_v47  ;;  %v895_v32 = vmul.f32 0.5, %v871_v21  ;;  %v874_v11 = vmul.f32 0.5, %v850_v22  ;;  %v851_v30 = vadd.f32 1.0, %v1183_v25 }
 0x11a   :  { %v1187_v12 = vpop.eup %1186  ;;  %1206 = vtanh.f32 %v885_v26  ;;  %v888_v17 = vmul.f32 0.5, %v864_v5  ;;  %v865_v37 = vmul.f32 0.5, %v841_v27  ;;  %v844_v38 = vadd.f32 1.0, %v1185_v28  ;;  %456 = vrot.lane.b32.xlu1 %v1576_v34, %s1332_s2 }
 0x11b   :  { %v1189_v42 = vpop.eup %1188  ;;  %1208 = vtanh.f32 %v895_v32  ;;  %v898_v43 = vmul.f32 0.5, %v874_v11  ;;  %v875_v44 = vmul.f32 0.5, %v851_v30  ;;  %v854_v45 = vadd.f32 1.0, %v1187_v12 }
 0x11c   :  { %v1191_v48 = vpop.eup %1190  ;;  %1210 = vtanh.f32 %v888_v17  ;;  %v889_v18 = vmul.f32 0.5, %v865_v37  ;;  %v868_v23 = vmul.f32 0.5, %v844_v38  ;;  %v845_v49 = vadd.f32 1.0, %v1189_v42 }
 0x11d   :  { %v1193_v50 = vpop.eup %1192  ;;  %1212 = vtanh.f32 %v898_v43  ;;  %v899_v24 = vmul.f32 0.5, %v875_v44  ;;  %v878_v51 = vmul.f32 0.5, %v854_v45  ;;  %v855_v52 = vadd.f32 1.0, %v1191_v48 }
 0x11e   :  { %v1195_v53 = vpop.eup %1194  ;;  %1214 = vtanh.f32 %v889_v18  ;;  %v892_v54 = vmul.f32 0.5, %v868_v23  ;;  %v869_v59 = vmul.f32 0.5, %v845_v49  ;;  %v848_v60 = vadd.f32 1.0, %v1193_v50 }
 0x11f   :  { %v1197_v61 = vpop.eup %1196  ;;  %1216 = vtanh.f32 %v899_v24  ;;  %v902_v55 = vmul.f32 0.5, %v878_v51  ;;  %v879_v0 = vmul.f32 0.5, %v855_v52  ;;  %v858_v1 = vadd.f32 1.0, %v1195_v53 }
 0x120   :  { %v1199_v57 = vpop.eup %1198  ;;  %1218 = vtanh.f32 %v892_v54  ;;  %v893_v62 = vmul.f32 0.5, %v869_v59  ;;  %v872_v2 = vmul.f32 0.5, %v848_v60  ;;  %v849_v3 = vadd.f32 1.0, %v1197_v61 }
 0x121   :  { %v1201_v7 = vpop.eup %1200  ;;  %1220 = vtanh.f32 %v902_v55  ;;  %v903_v29 = vmul.f32 0.5, %v879_v0  ;;  %v882_v8 = vmul.f32 0.5, %v858_v1  ;;  %v859_v58 = vadd.f32 1.0, %v1199_v57 }
 0x122   :  { %v1203_v9 = vpop.eup %1202  ;;  %1222 = vtanh.f32 %v893_v62  ;;  %v896_v13 = vmul.f32 0.5, %v872_v2  ;;  %v873_v39 = vmul.f32 0.5, %v849_v3  ;;  %v852_v16 = vadd.f32 1.0, %v1201_v7 }
 0x123   :  { %v1205_v35 = vpop.eup %1204  ;;  %1224 = vtanh.f32 %v903_v29  ;;  %v906_v41 = vmul.f32 0.5, %v882_v8  ;;  %v883_v19 = vmul.f32 0.5, %v859_v58  ;;  %v853_v47 = vadd.f32 1.0, %v1203_v9 }
 0x124   :  { %v1207_v21 = vpop.eup %1206  ;;  %v942_v22 = vadd.f32 1.0, %v1205_v35  ;;  %1226 = vtanh.f32 %v896_v13  ;;  %v897_v25 = vmul.f32 0.5, %v873_v39  ;;  %v876_v26 = vmul.f32 0.5, %v852_v16 }
 0x125   :  { %v1209_v5 = vpop.eup %1208  ;;  %v933_v27 = vadd.f32 1.0, %v1207_v21  ;;  %1228 = vtanh.f32 %v906_v41  ;;  %v907_v28 = vmul.f32 0.5, %v883_v19  ;;  %v877_v32 = vmul.f32 0.5, %v853_v47 }
 0x126   :  { %v1211_v11 = vpop.eup %1210  ;;  %v966_v30 = vmul.f32 0.5, %v942_v22  ;;  %v943_v12 = vadd.f32 1.0, %v1209_v5  ;;  %1230 = vtanh.f32 %v897_v25  ;;  %v900_v17 = vmul.f32 0.5, %v876_v26 }
 0x127   :  { %v1213_v37 = vpop.eup %1212  ;;  %v957_v38 = vmul.f32 0.5, %v933_v27  ;;  %v936_v42 = vadd.f32 1.0, %v1211_v11  ;;  %1232 = vtanh.f32 %v907_v28  ;;  %v901_v43 = vmul.f32 0.5, %v877_v32 }
 0x128   :  { %v1215_v44 = vpop.eup %1214  ;;  %1060 = vst [vmem:[%s1912_s4 + $0x150] sm:$0xff] %v966_v30  ;;  %v967_v45 = vmul.f32 0.5, %v943_v12  ;;  %v946_v48 = vadd.f32 1.0, %v1213_v37  ;;  %1234 = vtanh.f32 %v900_v17 }
 0x129   :  { %v1217_v18 = vpop.eup %1216  ;;  %981 = vst [vmem:[%s1912_s4 + $0x68] sm:$0xff] %v957_v38  ;;  %v960_v23 = vmul.f32 0.5, %v936_v42  ;;  %v937_v49 = vadd.f32 1.0, %v1215_v44  ;;  %1236 = vtanh.f32 %v901_v43 }
 0x12a   :  { %v1219_v50 = vpop.eup %1218  ;;  %1061 = vst [vmem:[%s1912_s4 + $0x158] sm:$0xff] %v967_v45  ;;  %v970_v24 = vmul.f32 0.5, %v946_v48  ;;  %v947_v51 = vadd.f32 1.0, %v1217_v18  ;;  %1238 = vtanh.f32 %v1602_v14  ;;  %v458_v48 = vlaneseq }
 0x12b   :  { %v1221_v52 = vpop.eup %1220  ;;  %982 = vst [vmem:[%s1912_s4 + $0x70] sm:$0xff] %v960_v23  ;;  %v961_v53 = vmul.f32 0.5, %v937_v49  ;;  %v940_v54 = vadd.f32 1.0, %v1219_v50  ;;  %1240 = vtanh.f32 %v1607_v33 }
 0x12c   :  { %v1223_v59 = vpop.eup %1222  ;;  %1062 = vst [vmem:[%s1912_s4 + $0x160] sm:$0xff] %v970_v24  ;;  %v971_v60 = vmul.f32 0.5, %v947_v51  ;;  %v950_v61 = vadd.f32 1.0, %v1221_v52  ;;  %v1674_v23 = vand.u32 127, %v458_v48 }
 0x12d   :  { %v1225_v55 = vpop.eup %1224  ;;  %983 = vst [vmem:[%s1912_s4 + $0x78] sm:$0xff] %v961_v53  ;;  %v964_v14 = vmul.f32 0.5, %v940_v54  ;;  %v941_v0 = vadd.f32 1.0, %v1223_v59 }
 0x12e   :  { %v1227_v1 = vpop.eup %1226  ;;  %1063 = vst [vmem:[%s1912_s4 + $0x168] sm:$0xff] %v971_v60  ;;  %v974_v33 = vmul.f32 0.5, %v950_v61  ;;  %v951_v57 = vadd.f32 1.0, %v1225_v55  ;;  %vm460_vm3 = vcmp.lt.s32.totalorder %v1674_v23, 16  ;;  %vm509_vm4 = vcmp.lt.s32.totalorder %v1674_v23, 32 }
 0x12f   :  { %v1229_v62 = vpop.eup %1228  ;;  %984 = vst [vmem:[%s1912_s4 + $0x80] sm:$0xff] %v964_v14  ;;  %v965_v2 = vmul.f32 0.5, %v941_v0  ;;  %v944_v3 = vadd.f32 1.0, %v1227_v1  ;;  %vm558_vm5 = vcmp.lt.s32.totalorder %v1674_v23, 64 }
 0x130   :  { %v1231_v7 = vpop.eup %1230  ;;  %1064 = vst [vmem:[%s1912_s4 + $0x170] sm:$0xff] %v974_v33  ;;  %v975_v29 = vmul.f32 0.5, %v951_v57  ;;  %v954_v8 = vadd.f32 1.0, %v1229_v62 }
 0x131   :  { %v1233_v58 = vpop.eup %1232  ;;  %985 = vst [vmem:[%s1912_s4 + $0x88] sm:$0xff] %v965_v2  ;;  %v968_v9 = vmul.f32 0.5, %v944_v3  ;;  %v945_v13 = vadd.f32 1.0, %v1231_v7 }
 0x132   :  { %v1235_v39 = vpop.eup %1234  ;;  %1065 = vst [vmem:[%s1912_s4 + $0x178] sm:$0xff] %v975_v29  ;;  %v978_v16 = vmul.f32 0.5, %v954_v8  ;;  %v955_v35 = vadd.f32 1.0, %v1233_v58 }
 0x133   :  { %v1237_v41 = vpop.eup %1236  ;;  %986 = vst [vmem:[%s1912_s4 + $0x90] sm:$0xff] %v968_v9  ;;  %v969_v19 = vmul.f32 0.5, %v945_v13  ;;  %v948_v47 = vadd.f32 1.0, %v1235_v39 }
 0x134   :  { %v1239_v21 = vpop.eup %1238  ;;  %1066 = vst [vmem:[%s1912_s4 + $0x180] sm:$0xff] %v978_v16  ;;  %v979_v22 = vmul.f32 0.5, %v955_v35  ;;  %v949_v25 = vadd.f32 1.0, %v1237_v41 }
 0x135   :  { %v1241_v26 = vpop.eup %1240  ;;  %987 = vst [vmem:[%s1912_s4 + $0x98] sm:$0xff] %v969_v19  ;;  %v972_v5 = vmul.f32 0.5, %v948_v47  ;;  %v856_v27 = vadd.f32 1.0, %v1239_v21 }
 0x136   :  { %1067 = vst [vmem:[%s1912_s4 + $0x188] sm:$0xff] %v979_v22  ;;  %v973_v28 = vmul.f32 0.5, %v949_v25  ;;  %v857_v32 = vadd.f32 1.0, %v1241_v26 }
 0x137   :  { %988 = vst [vmem:[%s1912_s4 + $0xa0] sm:$0xff] %v972_v5  ;;  %v880_v11 = vmul.f32 0.5, %v856_v27 }
 0x138   :  { %989 = vst [vmem:[%s1912_s4 + $0xa8] sm:$0xff] %v973_v28  ;;  %v881_v30 = vmul.f32 0.5, %v857_v32 }
 0x139   :  { %v904_v12 = vmul.f32 0.5, %v880_v11 }
 0x13a   :  { %v905_v17 = vmul.f32 0.5, %v881_v30 }
 0x13b   :  { %1242 = vtanh.f32 %v904_v12 }
 0x13c   :  { %1244 = vtanh.f32 %v905_v17 }
 0x145   :  { %v1243_v37 = vpop.eup %1242 }
 0x146   :  { %v1245_v38 = vpop.eup %1244  ;;  %v952_v42 = vadd.f32 1.0, %v1243_v37 }
 0x147   :  { %v953_v43 = vadd.f32 1.0, %v1245_v38 }
 0x148   :  { %v976_v44 = vmul.f32 0.5, %v952_v42 }
 0x149   :  { %v977_v45 = vmul.f32 0.5, %v953_v43 }
 0x14a   :  { %990 = vst [vmem:[%s1912_s4 + $0xb0] sm:$0xff] %v976_v44 }
 0x14b   :  { %991 = vst [vmem:[%s1912_s4 + $0xb8] sm:$0xff] %v977_v45 }
 0x174   :  { %v435_v18 = vpop.permute.xlu0 %434 }
 0x178   :  { %v437_v49 = vpop.permute.xlu1 %436  ;;  %v439_v50 = vpop.permute.xlu0 %438 }
 0x17c   :  { %v441_v24 = vpop.permute.xlu1 %440  ;;  %v447_v51 = vpop.permute.xlu0 %446 }
 0x17d   :  { %v467_v52 = vsel %vm460_vm3, %v447_v51, %v435_v18  ;;  %v461_v0 = vsel %vm460_vm3, %v435_v18, %v447_v51 }
 0x17e   :  { %v473_v53 = vadd.f32 %v1504_v31, %v467_v52  ;;  %v474_v62 = vadd.f32 %v1515_v63, %v461_v0 }
 0x180   :  { %v449_v54 = vpop.permute.xlu1 %448  ;;  %485 = vrot.lane.b32.xlu0 %v473_v53, %s1333_s22  ;;  %v451_v59 = vpop.permute.xlu0 %450 }
 0x181   :  { %v468_v60 = vsel %vm460_vm3, %v449_v54, %v437_v49  ;;  %v469_v61 = vsel %vm460_vm3, %v451_v59, %v439_v50  ;;  %v462_v3 = vsel %vm460_vm3, %v437_v49, %v449_v54  ;;  %v463_v7 = vsel %vm460_vm3, %v439_v50, %v451_v59 }
 0x182   :  { %v475_v55 = vadd.f32 %v1528_v10, %v468_v60  ;;  %v477_v14 = vadd.f32 %v1508_v56, %v469_v61  ;;  %v476_v58 = vadd.f32 %v1542_v40, %v462_v3  ;;  %v478_v9 = vadd.f32 %v1520_v4, %v463_v7 }
 0x184   :  { %487 = vrot.lane.b32.xlu1 %v475_v55, %s1333_s22  ;;  %v453_v1 = vpop.permute.xlu1 %452  ;;  %489 = vrot.lane.b32.xlu0 %v477_v14, %s1333_s22  ;;  %v443_v33 = vpop.permute.xlu0 %442 }
 0x185   :  { %v470_v57 = vsel %vm460_vm3, %v453_v1, %v441_v24  ;;  %v464_v13 = vsel %vm460_vm3, %v441_v24, %v453_v1 }
 0x186   :  { %v479_v2 = vadd.f32 %v1534_v15, %v470_v57  ;;  %v480_v35 = vadd.f32 %v1546_v46, %v464_v13 }
 0x188   :  { %491 = vrot.lane.b32.xlu1 %v479_v2, %s1333_s22  ;;  %v445_v29 = vpop.permute.xlu1 %444  ;;  %497 = vrot.lane.b32.xlu0 %v474_v62, %s1333_s22  ;;  %v455_v8 = vpop.permute.xlu0 %454 }
 0x189   :  { %v471_v39 = vsel %vm460_vm3, %v455_v8, %v443_v33  ;;  %v465_v19 = vsel %vm460_vm3, %v443_v33, %v455_v8  ;;  %v1005_v8 = vld [vmem:[%s1913_s3 + $0x8] sm:$0xff] }
 0x18a   :  { %v481_v41 = vadd.f32 %v1550_v20, %v471_v39  ;;  %v482_v21 = vadd.f32 %v1562_v6, %v465_v19  ;;  %1014 = vst [vmem:[%s1912_s4 + $0x190] sm:$0xf] %v1005_v8 }
 0x18c   :  { %499 = vrot.lane.b32.xlu1 %v476_v58, %s1333_s22  ;;  %v457_v16 = vpop.permute.xlu1 %456  ;;  %501 = vrot.lane.b32.xlu0 %v478_v9, %s1333_s22 }
 0x18d   :  { %v472_v47 = vsel %vm460_vm3, %v457_v16, %v445_v29  ;;  %v466_v25 = vsel %vm460_vm3, %v445_v29, %v457_v16  ;;  %v1004_v29 = vld [vmem:[%s1913_s3] sm:$0xff] }
 0x18e   :  { %v483_v22 = vadd.f32 %v1568_v36, %v472_v47  ;;  %v484_v26 = vadd.f32 %v1576_v34, %v466_v25  ;;  %1012 = vst [vmem:[%s1912_s4 + $0xc0] sm:$0xf] %v1004_v29 }
 0x190   :  { %503 = vrot.lane.b32.xlu1 %v480_v35, %s1333_s22  ;;  %493 = vrot.lane.b32.xlu0 %v481_v41, %s1333_s22 }
 0x194   :  { %495 = vrot.lane.b32.xlu1 %v483_v22, %s1333_s22  ;;  %505 = vrot.lane.b32.xlu0 %v482_v21, %s1333_s22 }
 0x198   :  { %507 = vrot.lane.b32.xlu1 %v484_v26, %s1333_s22 }
 0x1f2   :  { %v486_v5 = vpop.permute.xlu0 %485 }
 0x1f6   :  { %v488_v27 = vpop.permute.xlu1 %487  ;;  %v490_v28 = vpop.permute.xlu0 %489 }
 0x1fa   :  { %v492_v32 = vpop.permute.xlu1 %491  ;;  %v498_v11 = vpop.permute.xlu0 %497 }
 0x1fb   :  { %v516_v30 = vsel %vm509_vm4, %v498_v11, %v486_v5  ;;  %v510_v45 = vsel %vm509_vm4, %v486_v5, %v498_v11 }
 0x1fc   :  { %v522_v12 = vadd.f32 %v516_v30, %v473_v53  ;;  %v523_v50 = vadd.f32 %v510_v45, %v474_v62 }
 0x1fe   :  { %v500_v17 = vpop.permute.xlu1 %499  ;;  %534 = vrot.lane.b32.xlu0 %v522_v12, %s1334_s0  ;;  %v502_v37 = vpop.permute.xlu0 %501 }
 0x1ff   :  { %v517_v38 = vsel %vm509_vm4, %v500_v17, %v488_v27  ;;  %v518_v42 = vsel %vm509_vm4, %v502_v37, %v490_v28  ;;  %v511_v51 = vsel %vm509_vm4, %v488_v27, %v500_v17  ;;  %v512_v52 = vsel %vm509_vm4, %v490_v28, %v502_v37 }
 0x200   :  { %v1733_v43 = vadd.f32 %v517_v38, %v475_v55  ;;  %v1735_v44 = vadd.f32 %v518_v42, %v477_v14  ;;  %v525_v59 = vadd.f32 %v511_v51, %v476_v58  ;;  %v527_v60 = vadd.f32 %v512_v52, %v478_v9 }
 0x201   :  { %v1008_v58 = vcombine.high %v1004_v29, %v1004_v29  ;;  %v1009_v9 = vcombine.high %v1005_v8, %v1005_v8 }
 0x202   :  { %536 = vrot.lane.b32.xlu1 %v1733_v43, %s1334_s0  ;;  %v504_v48 = vpop.permute.xlu1 %503  ;;  %538 = vrot.lane.b32.xlu0 %v1735_v44, %s1334_s0  ;;  %v494_v18 = vpop.permute.xlu0 %493 }
 0x203   :  { %v519_v49 = vsel %vm509_vm4, %v504_v48, %v492_v32  ;;  %v513_v61 = vsel %vm509_vm4, %v492_v32, %v504_v48  ;;  %1013 = vst [vmem:[%s1912_s4 + $0xc8] sm:$0xf] %v1008_v58  ;;  %1015 = vst [vmem:[%s1912_s4 + $0x198] sm:$0xf] %v1009_v9 }
 0x204   :  { %v1745_v24 = vadd.f32 %v519_v49, %v479_v2  ;;  %v529_v0 = vadd.f32 %v513_v61, %v480_v35 }
 0x206   :  { %540 = vrot.lane.b32.xlu1 %v1745_v24, %s1334_s0  ;;  %v496_v53 = vpop.permute.xlu1 %495  ;;  %546 = vrot.lane.b32.xlu0 %v523_v50, %s1334_s0  ;;  %v506_v54 = vpop.permute.xlu0 %505 }
 0x207   :  { %v520_v55 = vsel %vm509_vm4, %v506_v54, %v494_v18  ;;  %v514_v33 = vsel %vm509_vm4, %v494_v18, %v506_v54 }
 0x208   :  { %v530_v1 = vadd.f32 %v520_v55, %v481_v41  ;;  %v531_v62 = vadd.f32 %v514_v33, %v482_v21 }
 0x20a   :  { %548 = vrot.lane.b32.xlu1 %v525_v59, %s1334_s0  ;;  %v508_v14 = vpop.permute.xlu1 %507  ;;  %550 = vrot.lane.b32.xlu0 %v527_v60, %s1334_s0 }
 0x20b   :  { %v521_v57 = vsel %vm509_vm4, %v508_v14, %v496_v53  ;;  %v515_v3 = vsel %vm509_vm4, %v496_v53, %v508_v14 }
 0x20c   :  { %v1766_v2 = vadd.f32 %v521_v57, %v483_v22  ;;  %v1773_v7 = vadd.f32 %v515_v3, %v484_v26 }
 0x20e   :  { %552 = vrot.lane.b32.xlu1 %v529_v0, %s1334_s0  ;;  %542 = vrot.lane.b32.xlu0 %v530_v1, %s1334_s0 }
 0x212   :  { %544 = vrot.lane.b32.xlu1 %v1766_v2, %s1334_s0  ;;  %554 = vrot.lane.b32.xlu0 %v531_v62, %s1334_s0 }
 0x216   :  { %556 = vrot.lane.b32.xlu1 %v1773_v7, %s1334_s0 }
 0x270   :  { %v535_v13 = vpop.permute.xlu0 %534 }
 0x274   :  { %v537_v39 = vpop.permute.xlu1 %536  ;;  %v539_v16 = vpop.permute.xlu0 %538 }
 0x278   :  { %v541_v35 = vpop.permute.xlu1 %540  ;;  %v547_v41 = vpop.permute.xlu0 %546 }
 0x279   :  { %v559_v19 = vsel %vm558_vm5, %v535_v13, %v547_v41  ;;  %v565_v47 = vsel %vm558_vm5, %v547_v41, %v535_v13 }
 0x27a   :  { %v571_v21 = vadd.f32 %v565_v47, %v522_v12  ;;  %v572_v22 = vadd.f32 %v559_v19, %v523_v50 }
 0x27c   :  { %v583_v25 = vadd.f32 %v572_v22, %v571_v21  ;;  %v549_v26 = vpop.permute.xlu1 %548  ;;  %v551_v5 = vpop.permute.xlu0 %550 }
 0x27d   :  { %v560_v27 = vsel %vm558_vm5, %v537_v39, %v549_v26  ;;  %v566_v28 = vsel %vm558_vm5, %v549_v26, %v537_v39  ;;  %v561_v32 = vsel %vm558_vm5, %v539_v16, %v551_v5  ;;  %v567_v11 = vsel %vm558_vm5, %v551_v5, %v539_v16 }
 0x27e   :  { %1246 = vrcp.f32 %v583_v25  ;;  %v573_v30 = vadd.f32 %v566_v28, %v1733_v43  ;;  %v574_v12 = vadd.f32 %v560_v27, %v525_v59  ;;  %v575_v17 = vadd.f32 %v567_v11, %v1735_v44 }
 0x27f   :  { %v576_v37 = vadd.f32 %v561_v32, %v527_v60 }
 0x280   :  { %v584_v38 = vadd.f32 %v574_v12, %v573_v30  ;;  %v553_v42 = vpop.permute.xlu1 %552  ;;  %v543_v45 = vpop.permute.xlu0 %542 }
 0x281   :  { %v585_v48 = vadd.f32 %v576_v37, %v575_v17  ;;  %v562_v18 = vsel %vm558_vm5, %v541_v35, %v553_v42  ;;  %v568_v49 = vsel %vm558_vm5, %v553_v42, %v541_v35 }
 0x282   :  { %1248 = vrcp.f32 %v584_v38  ;;  %v577_v50 = vadd.f32 %v568_v49, %v1745_v24  ;;  %v578_v51 = vadd.f32 %v562_v18, %v529_v0 }
 0x283   :  { %1250 = vrcp.f32 %v585_v48 }
 0x284   :  { %v586_v43 = vadd.f32 %v578_v51, %v577_v50  ;;  %v555_v52 = vpop.permute.xlu0 %554  ;;  %v545_v61 = vpop.permute.xlu1 %544 }
 0x285   :  { %v563_v44 = vsel %vm558_vm5, %v543_v45, %v555_v52  ;;  %v569_v53 = vsel %vm558_vm5, %v555_v52, %v543_v45 }
 0x286   :  { %1252 = vrcp.f32 %v586_v43  ;;  %v579_v54 = vadd.f32 %v569_v53, %v530_v1  ;;  %v580_v59 = vadd.f32 %v563_v44, %v531_v62 }
 0x288   :  { %v1247_v60 = vpop.eup %1246  ;;  %v587_v55 = vadd.f32 %v580_v59, %v579_v54 }
 0x289   :  { %v595_v14 = vmul.f32 %v1247_v60, %v1504_v31  ;;  %v596_v24 = vmul.f32 %v1247_v60, %v1515_v63  ;;  %v557_v63 = vpop.permute.xlu1 %556 }
 0x28a   :  { %1254 = vrcp.f32 %v587_v55  ;;  %v564_v32 = vsel %vm558_vm5, %v545_v61, %v557_v63 }
 0x28b   :  { %v607_v0 = vadd.f32 1.0, %v595_v14  ;;  %v608_v33 = vadd.f32 1.0, %v596_v24  ;;  %v679_v57 = vmul.f32 0.5, %v595_v14  ;;  %v680_v3 = vmul.f32 0.5, %v596_v24 }
 0x28c   :  { %v1249_v29 = vpop.eup %1248  ;;  %v582_v43 = vadd.f32 %v564_v32, %v1773_v7 }
 0x28d   :  { %v1251_v8 = vpop.eup %1250  ;;  %v619_v58 = vmul.f32 0.5, %v607_v0  ;;  %v620_v9 = vmul.f32 0.5, %v608_v33  ;;  %1256 = vtanh.f32 %v679_v57  ;;  %v597_v1 = vmul.f32 %v1249_v29, %v1528_v10 }
 0x28e   :  { %1258 = vtanh.f32 %v680_v3  ;;  %v598_v62 = vmul.f32 %v1249_v29, %v1542_v40  ;;  %v599_v13 = vmul.f32 %v1251_v8, %v1508_v56  ;;  %v600_v31 = vmul.f32 %v1251_v8, %v1520_v4 }
 0x28f   :  { %1260 = vtanh.f32 %v619_v58  ;;  %v609_v39 = vadd.f32 1.0, %v597_v1  ;;  %v681_v16 = vmul.f32 0.5, %v597_v1  ;;  %v570_v10 = vsel %vm558_vm5, %v557_v63, %v545_v61 }
 0x290   :  { %v1253_v35 = vpop.eup %1252  ;;  %1262 = vtanh.f32 %v620_v9  ;;  %v610_v41 = vadd.f32 1.0, %v598_v62  ;;  %v682_v19 = vmul.f32 0.5, %v598_v62  ;;  %v611_v47 = vadd.f32 1.0, %v599_v13 }
 0x291   :  { %v621_v21 = vmul.f32 0.5, %v609_v39  ;;  %1264 = vtanh.f32 %v681_v16  ;;  %v612_v22 = vadd.f32 1.0, %v600_v31  ;;  %v683_v25 = vmul.f32 0.5, %v599_v13 }
 0x292   :  { %v622_v40 = vmul.f32 0.5, %v610_v41  ;;  %1266 = vtanh.f32 %v682_v19  ;;  %v623_v56 = vmul.f32 0.5, %v611_v47  ;;  %v601_v26 = vmul.f32 %v1253_v35, %v1534_v15 }
 0x293   :  { %1268 = vtanh.f32 %v621_v21  ;;  %v624_v4 = vmul.f32 0.5, %v612_v22  ;;  %v602_v5 = vmul.f32 %v1253_v35, %v1546_v46  ;;  %v684_v28 = vmul.f32 0.5, %v600_v31 }
 0x294   :  { %v1255_v27 = vpop.eup %1254  ;;  %1270 = vtanh.f32 %v622_v40  ;;  %v613_v11 = vadd.f32 1.0, %v601_v26  ;;  %v581_v12 = vadd.f32 %v570_v10, %v1766_v2  ;;  %v685_v17 = vmul.f32 0.5, %v601_v26 }
 0x295   :  { %1272 = vtanh.f32 %v623_v56  ;;  %v614_v30 = vadd.f32 1.0, %v602_v5  ;;  %v603_v37 = vmul.f32 %v1255_v27, %v1550_v20  ;;  %v604_v38 = vmul.f32 %v1255_v27, %v1562_v6 }
 0x296   :  { %1274 = vtanh.f32 %v624_v4  ;;  %v625_v46 = vmul.f32 0.5, %v613_v11  ;;  %v686_v45 = vmul.f32 0.5, %v602_v5  ;;  %v588_v58 = vadd.f32 %v582_v43, %v581_v12 }
 0x297   :  { %v1257_v15 = vpop.eup %1256  ;;  %1276 = vtanh.f32 %v683_v25  ;;  %v626_v42 = vmul.f32 0.5, %v614_v30  ;;  %v615_v23 = vadd.f32 1.0, %v603_v37  ;;  %v616_v49 = vadd.f32 1.0, %v604_v38 }
 0x298   :  { %v1259_v48 = vpop.eup %1258  ;;  %v703_v18 = vadd.f32 1.0, %v1257_v15  ;;  %1278 = vtanh.f32 %v684_v28  ;;  %v687_v2 = vmul.f32 0.5, %v603_v37  ;;  %v688_v13 = vmul.f32 0.5, %v604_v38 }
 0x299   :  { %v1261_v50 = vpop.eup %1260  ;;  %v704_v51 = vadd.f32 1.0, %v1259_v48  ;;  %1280 = vtanh.f32 %v625_v46  ;;  %v627_v6 = vmul.f32 0.5, %v615_v23  ;;  %v628_v60 = vmul.f32 0.5, %v616_v49 }
 0x29a   :  { %v1263_v52 = vpop.eup %1262  ;;  %v643_v20 = vadd.f32 1.0, %v1261_v50  ;;  %v715_v44 = vmul.f32 0.5, %v703_v18  ;;  %1282 = vtanh.f32 %v626_v42 }
 0x29b   :  { %v1265_v53 = vpop.eup %1264  ;;  %v644_v54 = vadd.f32 1.0, %v1263_v52  ;;  %v716_v59 = vmul.f32 0.5, %v704_v51  ;;  %1284 = vtanh.f32 %v685_v17 }
 0x29c   :  { %v1267_v61 = vpop.eup %1266  ;;  %v655_v55 = vmul.f32 0.5, %v643_v20  ;;  %v727_v14 = vmul.f32 0.5, %v715_v44  ;;  %v705_v24 = vadd.f32 1.0, %v1265_v53  ;;  %1286 = vtanh.f32 %v686_v45 }
 0x29d   :  { %v1269_v0 = vpop.eup %1268  ;;  %v656_v33 = vmul.f32 0.5, %v644_v54  ;;  %v728_v57 = vmul.f32 0.5, %v716_v59  ;;  %v706_v3 = vadd.f32 1.0, %v1267_v61  ;;  %1288 = vtanh.f32 %v627_v6 }
 0x29e   :  { %v1271_v7 = vpop.eup %1270  ;;  %667 = vst [vmem:[%s1912_s4] sm:$0xff] %v655_v55  ;;  %1290 = vtanh.f32 %v727_v14  ;;  %v645_v29 = vadd.f32 1.0, %v1269_v0  ;;  %v717_v8 = vmul.f32 0.5, %v705_v24 }
 0x29f   :  { %v1273_v9 = vpop.eup %1272  ;;  %668 = vst [vmem:[%s1912_s4 + $0x8] sm:$0xff] %v656_v33  ;;  %1292 = vtanh.f32 %v728_v57  ;;  %v646_v1 = vadd.f32 1.0, %v1271_v7  ;;  %v718_v62 = vmul.f32 0.5, %v706_v3 }
 0x2a0   :  { %v1275_v31 = vpop.eup %1274  ;;  %v657_v63 = vmul.f32 0.5, %v645_v29  ;;  %v729_v39 = vmul.f32 0.5, %v717_v8  ;;  %v647_v16 = vadd.f32 1.0, %v1273_v9  ;;  %1294 = vtanh.f32 %v628_v60 }
 0x2a1   :  { %v1277_v35 = vpop.eup %1276  ;;  %v658_v41 = vmul.f32 0.5, %v646_v1  ;;  %v730_v19 = vmul.f32 0.5, %v718_v62  ;;  %v648_v47 = vadd.f32 1.0, %v1275_v31  ;;  %1296 = vtanh.f32 %v687_v2 }
 0x2a2   :  { %v1279_v21 = vpop.eup %1278  ;;  %669 = vst [vmem:[%s1912_s4 + $0x10] sm:$0xff] %v657_v63  ;;  %1298 = vtanh.f32 %v729_v39  ;;  %v659_v22 = vmul.f32 0.5, %v647_v16  ;;  %v707_v10 = vadd.f32 1.0, %v1277_v35 }
 0x2a3   :  { %v1281_v40 = vpop.eup %1280  ;;  %670 = vst [vmem:[%s1912_s4 + $0x18] sm:$0xff] %v658_v41  ;;  %1300 = vtanh.f32 %v730_v19  ;;  %v660_v56 = vmul.f32 0.5, %v648_v47  ;;  %v708_v25 = vadd.f32 1.0, %v1279_v21 }
 0x2a4   :  { %v1283_v4 = vpop.eup %1282  ;;  %671 = vst [vmem:[%s1912_s4 + $0x20] sm:$0xff] %v659_v22  ;;  %v719_v26 = vmul.f32 0.5, %v707_v10  ;;  %v649_v5 = vadd.f32 1.0, %v1281_v40  ;;  %1302 = vtanh.f32 %v688_v13 }
 0x2a5   :  { %v1285_v27 = vpop.eup %1284  ;;  %672 = vst [vmem:[%s1912_s4 + $0x28] sm:$0xff] %v660_v56  ;;  %v720_v28 = vmul.f32 0.5, %v708_v25  ;;  %v650_v32 = vadd.f32 1.0, %v1283_v4  ;;  %1304 = vrcp.f32 %v588_v58 }
 0x2a6   :  { %v1287_v11 = vpop.eup %1286  ;;  %v731_v30 = vmul.f32 0.5, %v719_v26  ;;  %v661_v12 = vmul.f32 0.5, %v649_v5  ;;  %v709_v17 = vadd.f32 1.0, %v1285_v27 }
 0x2a7   :  { %v1289_v37 = vpop.eup %1288  ;;  %v732_v38 = vmul.f32 0.5, %v720_v28  ;;  %v662_v15 = vmul.f32 0.5, %v650_v32  ;;  %v710_v46 = vadd.f32 1.0, %v1287_v11 }
 0x2a8   :  { %v1291_v42 = vpop.eup %1290  ;;  %1306 = vtanh.f32 %v731_v30  ;;  %673 = vst [vmem:[%s1912_s4 + $0x30] sm:$0xff] %v661_v12  ;;  %v721_v45 = vmul.f32 0.5, %v709_v17  ;;  %v651_v48 = vadd.f32 1.0, %v1289_v37 }
 0x2a9   :  { %v1293_v18 = vpop.eup %1292  ;;  %v751_v23 = vadd.f32 1.0, %v1291_v42  ;;  %1308 = vtanh.f32 %v732_v38  ;;  %674 = vst [vmem:[%s1912_s4 + $0x38] sm:$0xff] %v662_v15  ;;  %v722_v49 = vmul.f32 0.5, %v710_v46 }
 0x2aa   :  { %v1295_v50 = vpop.eup %1294  ;;  %v752_v51 = vadd.f32 1.0, %v1293_v18  ;;  %v733_v2 = vmul.f32 0.5, %v721_v45  ;;  %v663_v43 = vmul.f32 0.5, %v651_v48 }
 0x2ab   :  { %v1297_v52 = vpop.eup %1296  ;;  %v763_v20 = vmul.f32 0.5, %v751_v23  ;;  %v734_v44 = vmul.f32 0.5, %v722_v49  ;;  %v652_v6 = vadd.f32 1.0, %v1295_v50 }
 0x2ac   :  { %v1299_v53 = vpop.eup %1298  ;;  %v764_v54 = vmul.f32 0.5, %v752_v51  ;;  %1310 = vtanh.f32 %v733_v2  ;;  %675 = vst [vmem:[%s1912_s4 + $0x40] sm:$0xff] %v663_v43  ;;  %v711_v59 = vadd.f32 1.0, %v1297_v52 }
 0x2ad   :  { %v1301_v60 = vpop.eup %1300  ;;  %1044 = vst [vmem:[%s1912_s4 + $0xd0] sm:$0xff] %v763_v20  ;;  %v753_v61 = vadd.f32 1.0, %v1299_v53  ;;  %1312 = vtanh.f32 %v734_v44  ;;  %v664_v55 = vmul.f32 0.5, %v652_v6 }
 0x2ae   :  { %v1303_v14 = vpop.eup %1302  ;;  %1045 = vst [vmem:[%s1912_s4 + $0xd8] sm:$0xff] %v764_v54  ;;  %v754_v24 = vadd.f32 1.0, %v1301_v60  ;;  %v723_v0 = vmul.f32 0.5, %v711_v59 }
 0x2af   :  { %v1305_v33 = vpop.eup %1304  ;;  %v765_v57 = vmul.f32 0.5, %v753_v61  ;;  %676 = vst [vmem:[%s1912_s4 + $0x48] sm:$0xff] %v664_v55  ;;  %v712_v3 = vadd.f32 1.0, %v1303_v14 }
 0x2b0   :  { %v766_v7 = vmul.f32 0.5, %v754_v24  ;;  %v735_v29 = vmul.f32 0.5, %v723_v0  ;;  %v605_v8 = vmul.f32 %v1305_v33, %v1568_v36  ;;  %v606_v58 = vmul.f32 %v1305_v33, %v1576_v34 }
 0x2b1   :  { %1046 = vst [vmem:[%s1912_s4 + $0xe0] sm:$0xff] %v765_v57  ;;  %v724_v9 = vmul.f32 0.5, %v712_v3 }
 0x2b2   :  { %v1307_v1 = vpop.eup %1306  ;;  %1047 = vst [vmem:[%s1912_s4 + $0xe8] sm:$0xff] %v766_v7  ;;  %1314 = vtanh.f32 %v735_v29  ;;  %v617_v62 = vadd.f32 1.0, %v605_v8  ;;  %v618_v13 = vadd.f32 1.0, %v606_v58  ;;  %v689_v31 = vmul.f32 0.5, %v605_v8 }
 0x2b3   :  { %v1309_v63 = vpop.eup %1308  ;;  %v755_v39 = vadd.f32 1.0, %v1307_v1  ;;  %v736_v16 = vmul.f32 0.5, %v724_v9  ;;  %v690_v36 = vmul.f32 0.5, %v606_v58 }
 0x2b4   :  { %v756_v35 = vadd.f32 1.0, %v1309_v63  ;;  %v629_v34 = vmul.f32 0.5, %v617_v62  ;;  %v630_v41 = vmul.f32 0.5, %v618_v13  ;;  %1316 = vtanh.f32 %v689_v31 }
 0x2b5   :  { %v767_v19 = vmul.f32 0.5, %v755_v39  ;;  %1318 = vtanh.f32 %v736_v16 }
 0x2b6   :  { %v1311_v47 = vpop.eup %1310  ;;  %v768_v21 = vmul.f32 0.5, %v756_v35  ;;  %1320 = vtanh.f32 %v629_v34 }
 0x2b7   :  { %v1313_v22 = vpop.eup %1312  ;;  %1048 = vst [vmem:[%s1912_s4 + $0xf0] sm:$0xff] %v767_v19  ;;  %v757_v10 = vadd.f32 1.0, %v1311_v47  ;;  %1322 = vtanh.f32 %v630_v41 }
 0x2b8   :  { %1049 = vst [vmem:[%s1912_s4 + $0xf8] sm:$0xff] %v768_v21  ;;  %v758_v40 = vadd.f32 1.0, %v1313_v22  ;;  %1324 = vtanh.f32 %v690_v36 }
 0x2b9   :  { %v769_v56 = vmul.f32 0.5, %v757_v10 }
 0x2ba   :  { %v770_v25 = vmul.f32 0.5, %v758_v40 }
 0x2bb   :  { %1050 = vst [vmem:[%s1912_s4 + $0x100] sm:$0xff] %v769_v56 }
 0x2bc   :  { %v1315_v4 = vpop.eup %1314  ;;  %1051 = vst [vmem:[%s1912_s4 + $0x108] sm:$0xff] %v770_v25 }
 0x2bd   :  { %v759_v26 = vadd.f32 1.0, %v1315_v4 }
 0x2be   :  { %v1317_v5 = vpop.eup %1316 }
 0x2bf   :  { %v1319_v27 = vpop.eup %1318  ;;  %v771_v28 = vmul.f32 0.5, %v759_v26  ;;  %v713_v32 = vadd.f32 1.0, %v1317_v5 }
 0x2c0   :  { %v1321_v11 = vpop.eup %1320  ;;  %v760_v30 = vadd.f32 1.0, %v1319_v27 }
 0x2c1   :  { %v1323_v12 = vpop.eup %1322  ;;  %1052 = vst [vmem:[%s1912_s4 + $0x110] sm:$0xff] %v771_v28  ;;  %v653_v17 = vadd.f32 1.0, %v1321_v11  ;;  %v725_v37 = vmul.f32 0.5, %v713_v32 }
 0x2c2   :  { %v1325_v38 = vpop.eup %1324  ;;  %v772_v15 = vmul.f32 0.5, %v760_v30  ;;  %v654_v46 = vadd.f32 1.0, %v1323_v12 }
 0x2c3   :  { %v665_v42 = vmul.f32 0.5, %v653_v17  ;;  %v714_v45 = vadd.f32 1.0, %v1325_v38  ;;  %v737_v48 = vmul.f32 0.5, %v725_v37 }
 0x2c4   :  { %1053 = vst [vmem:[%s1912_s4 + $0x118] sm:$0xff] %v772_v15  ;;  %v666_v18 = vmul.f32 0.5, %v654_v46 }
 0x2c5   :  { %677 = vst [vmem:[%s1912_s4 + $0x50] sm:$0xff] %v665_v42  ;;  %v726_v23 = vmul.f32 0.5, %v714_v45  ;;  %1326 = vtanh.f32 %v737_v48 }
 0x2c6   :  { %678 = vst [vmem:[%s1912_s4 + $0x58] sm:$0xff] %v666_v18 }
 0x2c7   :  { %v738_v49 = vmul.f32 0.5, %v726_v23 }
 0x2c9   :  { %1328 = vtanh.f32 %v738_v49 }
 0x2cf   :  { %v1327_v50 = vpop.eup %1326 }
 0x2d0   :  { %v761_v51 = vadd.f32 1.0, %v1327_v50 }
 0x2d2   :  { %v773_v2 = vmul.f32 0.5, %v761_v51 }
 0x2d3   :  { %v1329_v43 = vpop.eup %1328 }
 0x2d4   :  { %v762_v52 = vadd.f32 1.0, %v1329_v43  ;;  %1054 = vst [vmem:[%s1912_s4 + $0x120] sm:$0xff] %v773_v2 }
 0x2d6   :  { %v774_v20 = vmul.f32 0.5, %v762_v52 }
 0x2d8   :  { %1055 = vst [vmem:[%s1912_s4 + $0x128] sm:$0xff] %v774_v20 }

</bundles_post_ra>
